<compile_context>
chip_gen: v6e
topology: v6e:2x2x1
jax: 0.10.0
libtpu: 0.0.40
codegen_flags: <defaults>
</compile_context>

<pallas_src>
import math

import jax
import jax.numpy as jnp
from jax.experimental import pallas as pl
from jax.experimental.pallas import tpu as pltpu

d_model = 32
max_len = 602
_LANES = 128


def make_pe_table(length=max_len, d=d_model):
    """Sin/cos positional-encoding table, identical to the torch buffer, shape (length, d)."""
    position = jnp.arange(length, dtype=jnp.float32)[:, None]                    # (L, 1)
    div_term = jnp.exp(jnp.arange(0, d, 2, dtype=jnp.float32)
                       * (-math.log(10000.0) / d))                               # (d//2,)
    ang = position * div_term                                                    # (L, d//2)
    pe = jnp.zeros((length, d), jnp.float32)
    pe = pe.at[:, 0::2].set(jnp.sin(ang))
    pe = pe.at[:, 1::2].set(jnp.cos(ang))
    return pe


# ---------------------------------------------------------------------------
# Kernels: purely HBM-bandwidth-bound elementwise ops on lane-dense 2-D tiles.
# ---------------------------------------------------------------------------
def _add_kernel(x_ref, pe_ref, o_ref):
    o_ref[...] = x_ref[...] + pe_ref[...]


def _add_dropout_kernel(x_ref, pe_ref, m_ref, o_ref):
    # m_ref already holds the inverted-dropout scale: 1/(1-p) where kept, 0 where dropped.
    o_ref[...] = (x_ref[...] + pe_ref[...]) * m_ref[...]


# ---------------------------------------------------------------------------
# Layout / tiling helpers.
# ---------------------------------------------------------------------------
def _lane_dense_view(a, S, B, D):
    """Contiguous (free) reshape to a lane-dense 2-D view.

    Preferred: (S*B*D/128, 128) -> full 128-lane rows, unmasked stores.
    Fallback (element count not 128-divisible): (S, B*D)."""
    n = S * B * D
    if n % _LANES == 0:
        return a.reshape(n // _LANES, _LANES)
    return a.reshape(S, B * D)


def _pick_block_rows(rows, row_bytes):
    """Adaptive row-tile size: single block for tiny problems, ~2 MiB blocks otherwise."""
    total = rows * row_bytes
    if total <= 4 * 1024 * 1024:
        # Per-grid-step overhead (~0.35 us) would exceed the HBM time; one block.
        return rows, 1
    target_block_bytes = 2 * 1024 * 1024
    tb = max(8, min(rows, target_block_bytes // row_bytes))
    tb = max(8, (tb // 8) * 8)          # keep the sublane dim a multiple of 8
    return tb, pl.cdiv(rows, tb)


# ---------------------------------------------------------------------------
# Wrapper.
# ---------------------------------------------------------------------------
def positional_encoding(x, pe, *, dropout_p=0.2, training=False, rng_key=None):
    """x: (seq, batch, d_model) f32;  pe: (max_len, d_model) f32  ->  (seq, batch, d_model)."""
    S, B, D = x.shape
    assert D == pe.shape[1]
    assert S <= pe.shape[0]
    orig_shape = x.shape

    # Pre-broadcast pe over batch in the wrapper (cheap at this size) so the
    # kernel input is already lane-dense and the add needs no cross-sublane
    # broadcast.  (For very large batch, replicating pe in-kernel would keep
    # pe HBM traffic at S*D instead of S*B*D.)
    pe_full = jnp.broadcast_to(pe[:S][:, None, :], (S, B, D)).astype(x.dtype)

    x2 = _lane_dense_view(x, S, B, D)
    pe2 = _lane_dense_view(pe_full, S, B, D)
    rows, lanes = x2.shape

    operands = [x2, pe2]
    if training and dropout_p > 0.0:
        if rng_key is None:
            rng_key = jax.random.PRNGKey(0)
        if dropout_p >= 1.0:
            scale = jnp.zeros((S, B, D), jnp.float32)
        else:
            keep = jax.random.bernoulli(rng_key, 1.0 - dropout_p, (S, B, D))
            scale = jnp.where(keep,
                              jnp.float32(1.0 / (1.0 - dropout_p)),
                              jnp.float32(0.0))
        operands.append(_lane_dense_view(scale.astype(x.dtype), S, B, D))
        kernel = _add_dropout_kernel
    else:
        kernel = _add_kernel

    tb, nsteps = _pick_block_rows(rows, lanes * x.dtype.itemsize)
    spec = pl.BlockSpec((tb, lanes), lambda i: (i, 0))

    out2 = pl.pallas_call(
        kernel,
        out_shape=jax.ShapeDtypeStruct((rows, lanes), x.dtype),
        grid_spec=pl.GridSpec(
            grid=(nsteps,),
            in_specs=[spec] * len(operands),
            out_specs=spec,
        ),
        compiler_params=pltpu.CompilerParams(
            # Data-parallel over row tiles -> shard across v7x's 2 TensorCores
            # when nsteps > 1 (harmless on v5e/v6e).
            dimension_semantics=("parallel",),
            # ~2 MiB blocks x 2 buffers x (<=3 inputs + 1 output) stays well
            # under this; safe for v7x's 64 MiB physical VMEM.
            vmem_limit_bytes=48 * 1024 * 1024,
        ),
    )(*operands)

    return out2.reshape(orig_shape)


if __name__ == "__main__":
    key = jax.random.PRNGKey(0)
    kx, kxl, kxr, kdrop = jax.random.split(key, 4)
    pe = make_pe_table()

    # x is (seq, batch, d_model), matching the torch broadcast against the
    # (max_len, 1, d_model) pe buffer.  Small shapes per the module.
    seq, batch = 8, 2
    x = jax.random.normal(kx, (seq, batch, d_model), jnp.float32)

    # Eval-mode forward (dropout is identity): must match the reference.
    out = jax.block_until_ready(positional_encoding(x, pe, training=False))
    ref = x + pe[:seq][:, None, :]
    assert out.shape == (seq, batch, d_model)
    assert jnp.allclose(out, ref, atol=1e-6, rtol=1e-6)

    # Full-length sequence (still a single lane-dense block: 602*2*32*4 ~ 150 KB).
    xl = jax.random.normal(kxl, (max_len, batch, d_model), jnp.float32)
    outl = jax.block_until_ready(positional_encoding(xl, pe, training=False))
    refl = xl + pe[:max_len][:, None, :]
    assert jnp.allclose(outl, refl, atol=1e-6, rtol=1e-6)

    # Ragged case where S*B*D is not 128-divisible -> (S, B*D) fallback view.
    xr = jax.random.normal(kxr, (7, 3, d_model), jnp.float32)
    outr = jax.block_until_ready(positional_encoding(xr, pe, training=False))
    refr = xr + pe[:7][:, None, :]
    assert jnp.allclose(outr, refr, atol=1e-6, rtol=1e-6)

    # Train-mode forward: inverted dropout (p=0.2) with a wrapper-generated,
    # reproducible mask fused into the kernel.  Reconstruct the exact mask to
    # check the output bit-for-bit.
    p = 0.2
    out_tr = jax.block_until_ready(
        positional_encoding(x, pe, dropout_p=p, training=True, rng_key=kdrop))
    keep_ref = jax.random.bernoulli(kdrop, 1.0 - p, (seq, batch, d_model))
    ref_tr = jnp.where(keep_ref, ref * (1.0 / (1.0 - p)), 0.0)
    assert out_tr.shape == (seq, batch, d_model)
    assert jnp.allclose(out_tr, ref_tr, atol=1e-5, rtol=1e-5)

    print("KERNEL_OK")
</pallas_src>

<mosaic_0001>
module attributes {stable_mosaic.version = 11 : i64} {
  func.func @_add_kernel(%arg0: i32, %arg1: memref<4x128xf32, #tpu.memory_space<vmem>>, %arg2: memref<4x128xf32, #tpu.memory_space<vmem>>, %arg3: memref<4x128xf32, #tpu.memory_space<vmem>>) attributes {dimension_semantics = [#tpu.dimension_semantics<parallel>], iteration_bounds = array<i64: 1>, scalar_prefetch = 0 : i64, scratch_operands = 0 : i64, tpu.core_type = #tpu.core_type<tc>, window_params = [{transform_indices = @transform_0, window_bounds = array<i64: 4, 128>}, {transform_indices = @transform_1, window_bounds = array<i64: 4, 128>}, {transform_indices = @transform_2, window_bounds = array<i64: 4, 128>}]} {
    %c0 = arith.constant 0 : index
    %c0_0 = arith.constant 0 : index
    %0 = vector.load %arg1[%c0, %c0_0] : memref<4x128xf32, #tpu.memory_space<vmem>>, vector<4x128xf32>
    %c0_1 = arith.constant 0 : index
    %c0_2 = arith.constant 0 : index
    %1 = vector.load %arg2[%c0_1, %c0_2] : memref<4x128xf32, #tpu.memory_space<vmem>>, vector<4x128xf32>
    %2 = arith.addf %0, %1 : vector<4x128xf32>
    %c0_3 = arith.constant 0 : index
    %c0_4 = arith.constant 0 : index
    %3 = vector.load %arg3[%c0_3, %c0_4] : memref<4x128xf32, #tpu.memory_space<vmem>>, vector<4x128xf32>
    tpu.vector_store %arg3[%c0_3, %c0_4], %2 {strides = array<i32>} : memref<4x128xf32, #tpu.memory_space<vmem>>, vector<4x128xf32>,
    return
  }
  func.func @transform_0(%arg0: i32) -> (i32, i32) {
    %c0_i32 = arith.constant 0 : i32
    %c0_i32_0 = arith.constant 0 : i32
    return %arg0, %c0_i32 : i32, i32
  }
  func.func @transform_1(%arg0: i32) -> (i32, i32) {
    %c0_i32 = arith.constant 0 : i32
    %c0_i32_0 = arith.constant 0 : i32
    return %arg0, %c0_i32 : i32, i32
  }
  func.func @transform_2(%arg0: i32) -> (i32, i32) {
    %c0_i32 = arith.constant 0 : i32
    %c0_i32_0 = arith.constant 0 : i32
    return %arg0, %c0_i32 : i32, i32
  }
}

</mosaic_0001>

<bundles_post_ra>
// kernel: tpu_custom_call.1
= control target key start
LH: loop header
LB: loop body
LE: loop exit
PB: predicated region body
PF: predicated region fallthrough
CT: control target
= control target key end

     0   :  { %7 = vsyncpa [#allocation3], 0  ;;  %s152_s0 = inlined_call_operand.hbm [shape: f32[4,128], index: 0, kind: input, shape index: {}]   ;;  %s153_s1 = inlined_call_operand.hbm [shape: f32[4,128], index: 1, kind: input, shape index: {}]   ;;  %s154_s2 = inlined_call_operand.hbm [shape: f32[4,128], index: 2, kind: output, shape index: {}]  }
   0x1   :  { %8 = vsyncpa [#allocation6], 0 }
   0x2   :  { %9 = vsyncpa [#allocation4], 0  ;;  %s125_s9 = smov [#allocation2]   ;;  %s126_s11 = smov [#allocation5]  }
   0x3   :  { %s16_s10 = sshll.u32 %s125_s9, 4  ;;  %s26_s12 = sshll.u32 %s126_s11, 4  ;;  %s17_s10 = int_to_ptr.vmem [resolvable:$true] %s16_s10  ;;  %s27_s12 = int_to_ptr.vmem [resolvable:$true] %s26_s12 }
   0x4   :  { %s67_s13 = scalar_lea.vmem %s17_s10, 64  ;;  %p72_p1 = scmp.lt.s32.totalorder %s17_s10, %s17_s10 }
   0x5   :  { %p68_p0 = scmp.ne.s32.totalorder %s17_s10, %s67_s13  ;;  %p73_p2 = scmp.lt.s32.totalorder %s67_s13, %s67_s13 }
   0x7   :  { %p74_p3 = por %p73_p2, %p72_p1 }
   0x9   :  { %p75_p4 = pnand %p74_p3, %p68_p0 }
   0xb   :  { %78 = shalt.err (!%p75_p4)
}
   0xc   :  { %19 = dma.hbm_to_vmem [thread:$0]  %s152_s0, 64, %s17_s10, [#allocation3]  }
   0xd   :  { %s87_s16 = scalar_lea.vmem %s27_s12, 64  ;;  %p92_p6 = scmp.lt.s32.totalorder %s27_s12, %s27_s12 }
   0xe   :  { %p88_p5 = scmp.ne.s32.totalorder %s27_s12, %s87_s16  ;;  %p93_p7 = scmp.lt.s32.totalorder %s87_s16, %s87_s16 }
  0x10   :  { %p94_p8 = por %p93_p7, %p92_p6 }
  0x12   :  { %p95_p9 = pnand %p94_p8, %p88_p5 }
  0x14   :  { %98 = shalt.err (!%p95_p9)
}
  0x15   :  { %29 = dma.hbm_to_vmem [thread:$0]  %s153_s1, 64, %s27_s12, [#allocation6]  }
  0x16   :  { %119 = dma.done.wait [#allocation3], 64  }
  0x17   :  { %120 = vsyncadd [#allocation3], 4294967232 }
  0x18   :  { %121 = dma.done.wait [#allocation6], 64  }
  0x19   :  { %122 = vsyncadd [#allocation6], 4294967232  ;;  %s127_s19 = smov [#allocation7]   ;;  %v36_v0 = vld [vmem:[#allocation2] sm:$0xf] }
  0x1a   :  { %s46_s20 = sshll.u32 %s127_s19, 4  ;;  %v37_v1 = vld [vmem:[#allocation5] sm:$0xf]  ;;  %s47_s20 = int_to_ptr.vmem [resolvable:$true] %s46_s20 }
  0x1b   :  { %v38_v2 = vadd.f32 %v37_v1, %v36_v0  ;;  %s99_s0 = scalar_lea.vmem %s47_s20, 64  ;;  %p104_p11 = scmp.lt.s32.totalorder %s47_s20, %s47_s20 }
  0x1c   :  { %p100_p10 = scmp.ne.s32.totalorder %s47_s20, %s99_s0  ;;  %p105_p12 = scmp.lt.s32.totalorder %s99_s0, %s99_s0 }
  0x1d   :  { %39 = vst [vmem:[#allocation7] sm:$0xf] %v38_v2 }
  0x1e   :  { %p106_p13 = por %p105_p12, %p104_p11 }
  0x20   :  { %p107_p0 = pnand %p106_p13, %p100_p10 }
  0x22   :  { %110 = shalt.err (!%p107_p0)
}
  0x23   :  { %49 = dma.vmem_to_hbm [thread:$0]  %s47_s20, 64, %s154_s2, [#allocation4]  }
  0x24   :  { %123 = dma.done.wait [#allocation4], 64  }
  0x25   :  { %124 = vsyncadd [#allocation4], 4294967232 }
  0x26   :  { %53 = vsyncpa [#allocation3], 1 }
  0x27   :  { %54 = vsyncpa [#allocation6], 1 }
  0x28   :  { %55 = vsyncpa [#allocation4], 1 }

</bundles_post_ra>
